<compile_context>
chip_gen: v6e
topology: v6e:2x2x1
jax: 0.10.0
libtpu: 0.0.40
codegen_flags: <defaults>
</compile_context>

<pallas_src>
import functools

import jax
import jax.numpy as jnp
from jax.experimental import pallas as pl
from jax.experimental.pallas import tpu as pltpu

_NEG_BIG = -1e30          # finite stand-in for -inf (avoids inf-inf -> NaN)
_MIB = 1024 * 1024


# --------------------------------------------------------------------------- #
# Kernels
# --------------------------------------------------------------------------- #
def _kd_kl_kernel(scores_ref, target_ref, rows_ref, *, inv_T):
    """Single-pass kernel: one (block_rows, C) tile holds the whole class axis."""
    s = scores_ref[...].astype(jnp.float32) * inv_T        # (TB, C)
    t = target_ref[...].astype(jnp.float32) * inv_T        # (TB, C)

    # Stable logsumexp for scores / T.
    s_max = jnp.max(s, axis=1, keepdims=True)
    s_sh = s - s_max
    log_zs = jnp.log(jnp.sum(jnp.exp(s_sh), axis=1, keepdims=True))    # (TB, 1)

    # Softmax statistics for target / T (normalization deferred to a per-row scalar).
    t_max = jnp.max(t, axis=1, keepdims=True)
    t_sh = t - t_max
    t_exp = jnp.exp(t_sh)
    zt = jnp.sum(t_exp, axis=1, keepdims=True)                         # (TB, 1)

    # Row KL = sum_c q*(t_sh - s_sh) + log_zs - log_zt          (sum_c q == 1)
    #        = (1/zt) * sum_c t_exp*(t_sh - s_sh) + log_zs - log_zt
    w = jnp.sum(t_exp * (t_sh - s_sh), axis=1, keepdims=True)
    rows_ref[...] = w * (1.0 / zt) + (log_zs - jnp.log(zt))


def _kd_kl_kernel_ctiled(scores_ref, target_ref, rows_ref,
                         ms_ref, zs_ref, mt_ref, zt_ref, w_ref,
                         *, inv_T, c_total, block_c):
    """Online (flash-style) kernel for vocab-scale C: grid = (row blocks, C blocks)."""
    j = pl.program_id(1)

    @pl.when(j == 0)
    def _():
        ms_ref[...] = jnp.full(ms_ref.shape, _NEG_BIG, jnp.float32)
        mt_ref[...] = jnp.full(mt_ref.shape, _NEG_BIG, jnp.float32)
        zs_ref[...] = jnp.zeros(zs_ref.shape, jnp.float32)
        zt_ref[...] = jnp.zeros(zt_ref.shape, jnp.float32)
        w_ref[...] = jnp.zeros(w_ref.shape, jnp.float32)

    s = scores_ref[...].astype(jnp.float32) * inv_T         # (TB, TC)
    t = target_ref[...].astype(jnp.float32) * inv_T         # (TB, TC)

    ragged = (c_total % block_c) != 0                        # static (trace time)
    if ragged:                                               # mask padded C tail
        col = j * block_c + jax.lax.broadcasted_iota(jnp.int32, s.shape, 1)
        valid = col < c_total
        s = jnp.where(valid, s, _NEG_BIG)
        t = jnp.where(valid, t, _NEG_BIG)

    # logsumexp(scores/T): running max + rescaled running sum.
    ms_old = ms_ref[...]
    ms_new = jnp.maximum(ms_old, jnp.max(s, axis=1, keepdims=True))
    zs_ref[...] = zs_ref[...] * jnp.exp(ms_old - ms_new) + jnp.sum(
        jnp.exp(s - ms_new), axis=1, keepdims=True)
    ms_ref[...] = ms_new

    # softmax(target/T) statistics + running weighted sum of (t - s).
    mt_old = mt_ref[...]
    mt_new = jnp.maximum(mt_old, jnp.max(t, axis=1, keepdims=True))
    alpha = jnp.exp(mt_old - mt_new)
    e_t = jnp.exp(t - mt_new)
    diff = t - s
    if ragged:
        diff = jnp.where(valid, diff, 0.0)
    zt_ref[...] = zt_ref[...] * alpha + jnp.sum(e_t, axis=1, keepdims=True)
    w_ref[...] = w_ref[...] * alpha + jnp.sum(e_t * diff, axis=1, keepdims=True)
    mt_ref[...] = mt_new

    @pl.when(j == pl.num_programs(1) - 1)
    def _():
        zt = zt_ref[...]
        log_zs = ms_ref[...] + jnp.log(zs_ref[...])
        log_zt = mt_ref[...] + jnp.log(zt)
        rows_ref[...] = w_ref[...] * (1.0 / zt) + (log_zs - log_zt)


# --------------------------------------------------------------------------- #
# Tiling heuristics
# --------------------------------------------------------------------------- #
def _vmem_budget_bytes():
    """(working-set budget, vmem_limit_bytes); generation-aware, v7x-safe fallback."""
    cap = 64 * _MIB                                    # conservative default (v7x)
    try:
        info = pltpu.get_tpu_info()
        cap_attr = getattr(info, "vmem_capacity_bytes", None)
        if cap_attr:
            cap = int(cap_attr)
    except Exception:
        pass
    limit = min((cap * 3) // 4, 96 * _MIB)             # 48 MiB on v7x, 96 on v5e/v6e
    return limit // 2, limit


def _round8_down(x):
    return (x // 8) * 8


def _per_row_bytes_full_c(c, itemsize):
    # 2 inputs x 2 pipeline buffers (native dtype) + ~8 f32 full-width temporaries
    # + the lane-padded (TB, 1) f32 output block, double-buffered.
    return c * (4 * itemsize + 8 * 4) + 2 * 128 * 4


def _pick_block_rows(n, c, itemsize, budget):
    if n < 16:
        return n                                        # one block covering the batch
    rows = budget // max(_per_row_bytes_full_c(c, itemsize), 1)
    rows = min(rows, (4 * _MIB) // max(c * itemsize, 1))      # ~4 MiB per input block
    rows = min(rows, max(8, _round8_down((n + 1) // 2)))      # >=2 blocks (v7x dual-TC)
    return max(8, _round8_down(rows))


def _pick_blocks_ctiled(n, c, itemsize, budget, block_rows, block_cols):
    per_elem = 4 * itemsize + 8 * 4
    if block_rows is None:
        block_rows = n if n < 16 else max(8, _round8_down(min(256, (n + 1) // 2)))
    if block_cols is None:
        cols = budget // max(block_rows * per_elem, 1)
        block_cols = max(128, (cols // 128) * 128)
    if block_cols >= c:
        block_cols = c
    return block_rows, block_cols


# --------------------------------------------------------------------------- #
# Wrapper
# --------------------------------------------------------------------------- #
def loss_fn_kd_kl(scores, target_scores, T=2.0, reduction="mean",
                  block_rows=None, block_cols=None):
    """Pallas implementation of loss_fn_kd_KL.forward.

    Tip: keep the logits in bf16 in HBM (the kernel casts to f32 internally);
    this roughly halves HBM traffic for this memory-bound kernel.
    """
    n, c = scores.shape
    assert target_scores.shape == (n, c)

    itemsize = jnp.dtype(scores.dtype).itemsize
    budget, vmem_limit = _vmem_budget_bytes()
    inv_T = 1.0 / float(T)

    # Tile the class axis only when even a minimal 8-row full-C block would
    # exceed the VMEM budget (vocab-scale C), or when explicitly forced.
    tile_c = (block_cols is not None) or (
        _per_row_bytes_full_c(c, itemsize) * 8 > budget)

    if not tile_c:
        if block_rows is None:
            block_rows = _pick_block_rows(n, c, itemsize, budget)
        n_blocks = pl.cdiv(n, block_rows)
        kernel = functools.partial(_kd_kl_kernel, inv_T=inv_T)
        rows2d = pl.pallas_call(
            kernel,
            out_shape=jax.ShapeDtypeStruct((n, 1), jnp.float32),
            grid_spec=pltpu.PrefetchScalarGridSpec(
                num_scalar_prefetch=0,
                grid=(n_blocks,),
                in_specs=[
                    pl.BlockSpec((block_rows, c), lambda i: (i, 0)),
                    pl.BlockSpec((block_rows, c), lambda i: (i, 0)),
                ],
                out_specs=pl.BlockSpec((block_rows, 1), lambda i: (i, 0)),
            ),
            compiler_params=pltpu.CompilerParams(
                dimension_semantics=("parallel",),
                vmem_limit_bytes=vmem_limit,
            ),
        )(scores, target_scores)
    else:
        block_rows, block_cols = _pick_blocks_ctiled(
            n, c, itemsize, budget, block_rows, block_cols)
        assert block_cols == c or block_cols % 128 == 0, (
            "class-axis tile must be a multiple of 128 (or the full class dim)")
        n_blocks = pl.cdiv(n, block_rows)
        c_blocks = pl.cdiv(c, block_cols)
        kernel = functools.partial(_kd_kl_kernel_ctiled, inv_T=inv_T,
                                   c_total=c, block_c=block_cols)
        rows2d = pl.pallas_call(
            kernel,
            out_shape=jax.ShapeDtypeStruct((n, 1), jnp.float32),
            grid_spec=pltpu.PrefetchScalarGridSpec(
                num_scalar_prefetch=0,
                grid=(n_blocks, c_blocks),
                in_specs=[
                    pl.BlockSpec((block_rows, block_cols), lambda i, j: (i, j)),
                    pl.BlockSpec((block_rows, block_cols), lambda i, j: (i, j)),
                ],
                out_specs=pl.BlockSpec((block_rows, 1), lambda i, j: (i, 0)),
                scratch_shapes=[pltpu.VMEM((block_rows, 1), jnp.float32)] * 5,
            ),
            compiler_params=pltpu.CompilerParams(
                dimension_semantics=("parallel", "arbitrary"),
                vmem_limit_bytes=vmem_limit,
            ),
        )(scores, target_scores)

    rows = rows2d[:, 0]
    if "mean" in reduction:
        return jnp.mean(rows)
    return rows


# --------------------------------------------------------------------------- #
# Pure-JAX reference & tests
# --------------------------------------------------------------------------- #
def _reference(scores, target_scores, T=2.0, reduction="mean"):
    log_p = jax.nn.log_softmax(scores / T, axis=1)
    q = jax.nn.softmax(target_scores / T, axis=1)
    loss = jnp.sum(q * (jnp.log(q) - log_p), axis=1)
    if "mean" in reduction:
        loss = jnp.mean(loss)
    return loss


if __name__ == "__main__":
    key = jax.random.PRNGKey(0)
    k1, k2, k3, k4, k5, k6 = jax.random.split(key, 6)

    # Case 1: small f32 logits (typical classifier head), divisible batch,
    # auto tile sizing (2 parallel row blocks).
    N, C = 16, 32
    scores = jax.random.normal(k1, (N, C), dtype=jnp.float32) * 3.0
    target_scores = jax.random.normal(k2, (N, C), dtype=jnp.float32) * 3.0
    out_mean = jax.block_until_ready(loss_fn_kd_kl(scores, target_scores, T=2.0))
    out_none = jax.block_until_ready(
        loss_fn_kd_kl(scores, target_scores, T=2.0, reduction="none"))
    ref_mean = _reference(scores, target_scores, T=2.0)
    ref_none = _reference(scores, target_scores, T=2.0, reduction="none")
    assert out_none.shape == (N,)
    assert jnp.allclose(out_mean, ref_mean, atol=1e-5, rtol=1e-5), (out_mean, ref_mean)
    assert jnp.allclose(out_none, ref_none, atol=1e-5, rtol=1e-5)

    # Case 2: bf16 inputs, ragged batch (N % block_rows != 0) -> no jnp.pad;
    # the last block's out-of-range rows are masked out of the writeback.
    N2, C2 = 20, 40
    s2 = (jax.random.normal(k3, (N2, C2), dtype=jnp.float32) * 3.0).astype(jnp.bfloat16)
    t2 = (jax.random.normal(k4, (N2, C2), dtype=jnp.float32) * 3.0).astype(jnp.bfloat16)
    out2_mean = jax.block_until_ready(
        loss_fn_kd_kl(s2, t2, T=2.0, reduction="mean", block_rows=8))
    out2_none = jax.block_until_ready(
        loss_fn_kd_kl(s2, t2, T=2.0, reduction="none", block_rows=8))
    ref2_mean = _reference(s2.astype(jnp.float32), t2.astype(jnp.float32), T=2.0)
    ref2_none = _reference(s2.astype(jnp.float32), t2.astype(jnp.float32), T=2.0,
                           reduction="none")
    assert out2_none.shape == (N2,)
    assert jnp.allclose(out2_mean, ref2_mean, atol=1e-4, rtol=1e-4), (out2_mean, ref2_mean)
    assert jnp.allclose(out2_none, ref2_none, atol=1e-4, rtol=1e-4)

    # Case 3: class-tiled online (vocab-scale fallback) path, forced with small
    # tiles; ragged in both the row and class axes (exercises the in-kernel mask).
    N3, C3 = 20, 300
    s3 = jax.random.normal(k5, (N3, C3), dtype=jnp.float32) * 3.0
    t3 = jax.random.normal(k6, (N3, C3), dtype=jnp.float32) * 3.0
    out3_mean = jax.block_until_ready(
        loss_fn_kd_kl(s3, t3, T=2.0, reduction="mean", block_rows=8, block_cols=128))
    out3_none = jax.block_until_ready(
        loss_fn_kd_kl(s3, t3, T=2.0, reduction="none", block_rows=8, block_cols=128))
    ref3_mean = _reference(s3, t3, T=2.0)
    ref3_none = _reference(s3, t3, T=2.0, reduction="none")
    assert out3_none.shape == (N3,)
    assert jnp.allclose(out3_mean, ref3_mean, atol=1e-4, rtol=1e-4), (out3_mean, ref3_mean)
    assert jnp.allclose(out3_none, ref3_none, atol=1e-4, rtol=1e-4)

    print("KERNEL_OK")
</pallas_src>

<mosaic_0001>
module attributes {stable_mosaic.version = 11 : i64} {
  func.func @_kd_kl_kernel(%arg0: i32, %arg1: memref<8x32xf32, #tpu.memory_space<vmem>>, %arg2: memref<8x32xf32, #tpu.memory_space<vmem>>, %arg3: memref<8x1xf32, #tpu.memory_space<vmem>>) attributes {dimension_semantics = [#tpu.dimension_semantics<parallel>], iteration_bounds = array<i64: 2>, scalar_prefetch = 0 : i64, scratch_operands = 0 : i64, tpu.core_type = #tpu.core_type<tc>, window_params = [{transform_indices = @transform_0, window_bounds = array<i64: 8, 32>}, {transform_indices = @transform_1, window_bounds = array<i64: 8, 32>}, {transform_indices = @transform_2, window_bounds = array<i64: 8, 1>}]} {
    %c0 = arith.constant 0 : index
    %c0_0 = arith.constant 0 : index
    %0 = vector.load %arg1[%c0, %c0_0] : memref<8x32xf32, #tpu.memory_space<vmem>>, vector<8x32xf32>
    %cst = arith.constant 5.000000e-01 : f32
    %1 = vector.broadcast %cst : f32 to vector<8x32xf32>
    %2 = arith.mulf %0, %1 : vector<8x32xf32>
    %c0_1 = arith.constant 0 : index
    %c0_2 = arith.constant 0 : index
    %3 = vector.load %arg2[%c0_1, %c0_2] : memref<8x32xf32, #tpu.memory_space<vmem>>, vector<8x32xf32>
    %cst_3 = arith.constant 5.000000e-01 : f32
    %4 = vector.broadcast %cst_3 : f32 to vector<8x32xf32>
    %5 = arith.mulf %3, %4 : vector<8x32xf32>
    %cst_4 = arith.constant dense<0xFF800000> : vector<8xf32>
    %6 = vector.multi_reduction <maximumf>, %2, %cst_4 [1] : vector<8x32xf32> to vector<8xf32>
    %7 = vector.shape_cast %6 : vector<8xf32> to vector<8x1xf32>
    %8 = vector.broadcast %7 : vector<8x1xf32> to vector<8x32xf32>
    %9 = arith.subf %2, %8 : vector<8x32xf32>
    %10 = math.exp %9 : vector<8x32xf32>
    %cst_5 = arith.constant dense<0.000000e+00> : vector<8xf32>
    %11 = vector.multi_reduction <add>, %10, %cst_5 [1] : vector<8x32xf32> to vector<8xf32>
    %12 = vector.shape_cast %11 : vector<8xf32> to vector<8x1xf32>
    %13 = math.log %12 : vector<8x1xf32>
    %cst_6 = arith.constant dense<0xFF800000> : vector<8xf32>
    %14 = vector.multi_reduction <maximumf>, %5, %cst_6 [1] : vector<8x32xf32> to vector<8xf32>
    %15 = vector.shape_cast %14 : vector<8xf32> to vector<8x1xf32>
    %16 = vector.broadcast %15 : vector<8x1xf32> to vector<8x32xf32>
    %17 = arith.subf %5, %16 : vector<8x32xf32>
    %18 = math.exp %17 : vector<8x32xf32>
    %cst_7 = arith.constant dense<0.000000e+00> : vector<8xf32>
    %19 = vector.multi_reduction <add>, %18, %cst_7 [1] : vector<8x32xf32> to vector<8xf32>
    %20 = vector.shape_cast %19 : vector<8xf32> to vector<8x1xf32>
    %21 = arith.subf %17, %9 : vector<8x32xf32>
    %22 = arith.mulf %18, %21 : vector<8x32xf32>
    %cst_8 = arith.constant dense<0.000000e+00> : vector<8xf32>
    %23 = vector.multi_reduction <add>, %22, %cst_8 [1] : vector<8x32xf32> to vector<8xf32>
    %24 = vector.shape_cast %23 : vector<8xf32> to vector<8x1xf32>
    %cst_9 = arith.constant 1.000000e+00 : f32
    %25 = vector.broadcast %cst_9 : f32 to vector<8x1xf32>
    %26 = arith.divf %25, %20 : vector<8x1xf32>
    %27 = arith.mulf %24, %26 : vector<8x1xf32>
    %28 = math.log %20 : vector<8x1xf32>
    %29 = arith.subf %13, %28 : vector<8x1xf32>
    %30 = arith.addf %27, %29 : vector<8x1xf32>
    %c0_10 = arith.constant 0 : index
    %c0_11 = arith.constant 0 : index
    %31 = vector.load %arg3[%c0_10, %c0_11] : memref<8x1xf32, #tpu.memory_space<vmem>>, vector<8x1xf32>
    tpu.vector_store %arg3[%c0_10, %c0_11], %30 {strides = array<i32>} : memref<8x1xf32, #tpu.memory_space<vmem>>, vector<8x1xf32>,
    return
  }
  func.func @transform_0(%arg0: i32) -> (i32, i32) {
    %c0_i32 = arith.constant 0 : i32
    %c0_i32_0 = arith.constant 0 : i32
    return %arg0, %c0_i32 : i32, i32
  }
  func.func @transform_1(%arg0: i32) -> (i32, i32) {
    %c0_i32 = arith.constant 0 : i32
    %c0_i32_0 = arith.constant 0 : i32
    return %arg0, %c0_i32 : i32, i32
  }
  func.func @transform_2(%arg0: i32) -> (i32, i32) {
    %c0_i32 = arith.constant 0 : i32
    %c0_i32_0 = arith.constant 0 : i32
    return %arg0, %c0_i32 : i32, i32
  }
}

</mosaic_0001>

<bundles_post_ra>
// kernel: tpu_custom_call.1
= control target key start
LH: loop header
LB: loop body
LE: loop exit
PB: predicated region body
PF: predicated region fallthrough
CT: control target
= control target key end

     0   :  { %7 = vsyncpa [#allocation3], 0  ;;  %s660_s0 = inlined_call_operand.hbm [shape: f32[16,32], index: 0, kind: input, shape index: {}]   ;;  %s661_s1 = inlined_call_operand.hbm [shape: f32[16,32], index: 1, kind: input, shape index: {}]   ;;  %s662_s2 = inlined_call_operand.vmem [shape: f32[16,1], index: 2, kind: output, shape index: {}]  }
   0x1   :  { %9 = vsyncpa [#allocation3 + $0x1], 0 }
   0x2   :  { %10 = vsyncpa [#allocation5], 0 }
   0x3   :  { %12 = vsyncpa [#allocation5 + $0x1], 0  ;;  %s503_s9 = smov 0   ;;  %s505_s10 = smov 0  }
   0x4   :  { %s507_s11 = smov 0   ;;  %s509_s12 = smov 0  }
   0x5 LB: > { %s522_s13 = sadd.s32 4294967295, %s484_s12   ;;  %s525_s14 = sadd.s32 1, %s484_s12   ;;  %s484_s12 = sphi %s509_s12, %s674_s12   ;;  %s480_s11 = sphi %s507_s11, %s673_s11   ;;  %s476_s10 = sphi %s505_s10, %s672_s10   ;;  %s472_s9 = sphi %s503_s9, %s671_s9  }
   0x6   : > { %s22_s15 = ssub.s32 %s484_s12, %s525_s14  ;;  %s25_s16 = sadd.s32 1, %s480_s11 }
   0x7   : > { %p23_p0 = scmp.eq.s32.totalorder %s22_s15, 0  ;;  %p32_p1 = scmp.ne.s32.totalorder %s480_s11, %s476_s10 }
   0x8   : > { %p33_p2 = scmp.eq.s32.totalorder %s484_s12, 0  ;;  %p38_p3 = scmp.ne.s32.totalorder %s476_s10, %s472_s9 }
   0x9   : > { %s535_s17 = scalar_select %p23_p0, %s480_s11, %s25_s16  }
   0xa   : > { %p34_p4 = por %p33_p2, %p32_p1  ;;  %p39_p5 = scmp.eq.s32.totalorder %s522_s13, 0 }
   0xb   : > { %p347_p6 = scmp.lt.s32.totalorder %s484_s12, 2  ;;  %s544_s19 = sand.u32 1, %s480_s11  }
   0xc   : > { %p539_p7 = por %p39_p5, %p38_p3  ;;  %s326_s20 = sshll.u32 %s544_s19, 3 }
   0xd   : > { %s327_s21 = sshll.u32 %s484_s12, 7  ;;  %s118_s25 = scalar_lea.vmem [#allocation2], %s326_s20 }
   0xe   : > { %s664_s18 = scalar_select %p539_p7, 1, 0 }
   0xf   : > { %s553_s24 = scalar_lea.hbm %s660_s0, %s327_s21  ;;  %s125_s26 = sshll.u32 %s118_s25, 4  ;;  %s557_s26 = int_to_ptr.vmem [resolvable:$true] %s125_s26 }
  0x10   : > { %p559_p8 = pnand %p347_p6, %p34_p4  ;;  %s115_s28 = scalar_lea.sflag [#allocation3], %s544_s19 }
  0x11   : > { %s390_s29 = scalar_lea.hbm %s553_s24, 128  ;;  %s395_s4 = scalar_lea.hbm %s660_s0, 256 }
  0x12   : > { %p391_p11 = scmp.ne.s32.totalorder %s553_s24, %s390_s29  ;;  %p392_p12 = pneg %p559_p8 }
  0x13   : > { %p396_p1 = scmp.lt.s32.totalorder %s553_s24, %s660_s0  ;;  %p397_p2 = scmp.lt.s32.totalorder %s395_s4, %s390_s29 }
  0x14   : > { %p393_p13 = pnand %p392_p12, %p391_p11 }
  0x15   : > { %p398_p3 = por %p397_p2, %p396_p1 }
  0x16   : > { %p394_p0 = pneg %p393_p13 }
  0x18   : > { %p399_p4 = pnand %p398_p3, %p394_p0 }
  0x1a   : > { %402 = shalt.err (!%p399_p4)
}
  0x1b   : > { %s403_s7 = scalar_lea.vmem %s557_s26, 128  ;;  %s486_s8 = smov [#allocation2]  }
  0x1c   : > { %p404_p5 = scmp.ne.s32.totalorder %s557_s26, %s403_s7  ;;  %s408_s9 = sshll.u32 %s486_s8, 4  ;;  %s409_s9 = int_to_ptr.vmem [resolvable:$false] %s408_s9 }
  0x1d   : > { %s410_s15 = scalar_lea.vmem %s409_s9, 256  ;;  %p411_p13 = scmp.lt.s32.totalorder %s557_s26, %s409_s9 }
  0x1e   : > { %p406_p6 = pnand %p404_p5, %p392_p12  ;;  %p412_p9 = scmp.lt.s32.totalorder %s410_s15, %s403_s7 }
  0x20   : > { %p407_p11 = pneg %p406_p6  ;;  %p413_p10 = por %p412_p9, %p411_p13 }
  0x22   : > { %p414_p1 = pnand %p413_p10, %p407_p11 }
  0x24   : > { %417 = shalt.err (!%p414_p1)
}
  0x25   : > { %343 = dma.hbm_to_vmem [thread:$0]  (!%p559_p8), %s553_s24, 128, %s557_s26, %s115_s28  }
  0x26   : > { %p666_p0 = scmp.lt.s32.totalorder %s484_s12, 3  ;;  %p667_p2 = scmp.ge.s32.totalorder %s484_s12, 1 }
  0x27   : > { %s603_s25 = scalar_lea.hbm %s661_s1, %s327_s21  ;;  %s136_s29 = scalar_lea.vmem [#allocation4], %s326_s20 }
  0x28   : > { %p594_p3 = pnand %p667_p2, %p666_p0  ;;  %s143_s30 = sshll.u32 %s136_s29, 4  ;;  %s144_s30 = int_to_ptr.vmem [resolvable:$true] %s143_s30 }
  0x29   : > { %s133_s24 = scalar_lea.sflag [#allocation5], %s544_s19  ;;  %s418_s26 = scalar_lea.hbm %s603_s25, 128 }
  0x2a   : > { %s668_s16 = scalar_select %p594_p3, 1, 0 }
  0x2b   : > { %p419_p9 = scmp.ne.s32.totalorder %s603_s25, %s418_s26  ;;  %s423_s3 = scalar_lea.hbm %s661_s1, 256 }
  0x2c   : > { %p424_p5 = scmp.lt.s32.totalorder %s603_s25, %s661_s1  ;;  %p425_p6 = scmp.lt.s32.totalorder %s423_s3, %s418_s26 }
  0x2d   : > { %p421_p10 = pnand %p419_p9, %p392_p12 }
  0x2e   : > { %p426_p11 = por %p425_p6, %p424_p5 }
  0x2f   : > { %p422_p4 = pneg %p421_p10 }
  0x31   : > { %p427_p13 = pnand %p426_p11, %p422_p4 }
  0x33   : > { %430 = shalt.err (!%p427_p13)
}
  0x34   : > { %s431_s20 = scalar_lea.vmem %s144_s30, 128  ;;  %s487_s19 = smov [#allocation4]  }
  0x35   : > { %p432_p1 = scmp.ne.s32.totalorder %s144_s30, %s431_s20  ;;  %s436_s5 = sshll.u32 %s487_s19, 4  ;;  %s437_s5 = int_to_ptr.vmem [resolvable:$false] %s436_s5 }
  0x36   : > { %s438_s6 = scalar_lea.vmem %s437_s5, 256  ;;  %p439_p9 = scmp.lt.s32.totalorder %s144_s30, %s437_s5 }
  0x37   : > { %p434_p0 = pnand %p432_p1, %p392_p12  ;;  %p440_p10 = scmp.lt.s32.totalorder %s438_s6, %s431_s20 }
  0x39   : > { %p435_p2 = pneg %p434_p0  ;;  %p441_p7 = por %p440_p10, %p439_p9 }
  0x3b   : > { %p442_p3 = pnand %p441_p7, %p435_p2 }
  0x3d   : > { %445 = shalt.err (!%p442_p3)
}
  0x3e   : > { %346 = dma.hbm_to_vmem [thread:$0]  (!%p559_p8), %s603_s25, 128, %s144_s30, %s133_s24  }
  0x3f   : > { %p669_p4 = scmp.ne.s32.totalorder %s668_s16, 0 }
  0x40   : > { %s154_s7 = sand.u32 (!%p669_p4), 1, %s476_s10   ;;  %p670_p12 = scmp.ne.s32.totalorder (!%p669_p4), %s664_s18, 0 }
  0x41   : > { %152 = sbr.rel (%p669_p4) target bundleno = 398 (0x18e), region = 28  ;;  %s331_s8 = sshll.u32 (!%p669_p4), %s154_s7, 3 }
  0x42   : > { %s155_s9 = scalar_lea.sflag (!%p669_p4), [#allocation3], %s154_s7  ;;  %s158_s15 = scalar_lea.vmem (!%p669_p4), [#allocation2], %s331_s8 }
  0x46   : > { %463 = dma.done.wait (%p670_p12), %s155_s9, 128  }
  0x47   : > { %465 = vsyncadd (%p670_p12), %s155_s9, 4294967168  ;;  %s164_s22 = scalar_lea.sflag [#allocation5], %s154_s7  ;;  %s167_s23 = scalar_lea.vmem [#allocation4], %s331_s8 }
  0x48   : > { %467 = dma.done.wait (%p670_p12), %s164_s22, 128  }
  0x49   : > { %469 = vsyncadd (%p670_p12), %s164_s22, 4294967168  ;;  %v196_v0 = vld [vmem:[%s158_s15] sm:$0xff]  ;;  %vm200_vm0 = vcmask 261120   ;;  %v198_v1 = vld [vmem:[%s167_s23] sm:$0xff]  ;;  %p192_p7 = scmp.lt.s32.totalorder %s522_s13, 1  ;;  %vm233_vm1 = vcmask 7168  }
  0x4a   : > { %v197_v2 = vmul.f32 0.5, %v196_v0  ;;  %v199_v3 = vmul.f32 0.5, %v198_v1 }
  0x4b   : > { %s676_s13 = smov (!%p192_p7, %s522_s13), 1 }
  0x4c   : > { %v201_v4 = vsel %vm200_vm0, %v197_v2, -inf  ;;  %v212_v5 = vsel %vm200_vm0, %v199_v3, -inf  ;;  %s333_s18 = sshll.u32 %s676_s13, 3 }
  0x4d   : > { %202 = vmax.xlane.f32.xlu0 %v201_v4  ;;  %s195_s25 = scalar_lea.vmem %s662_s2, %s333_s18 }
  0x51   : > { %213 = vmax.xlane.f32.xlu0 %v212_v5 }
  0xd6   : > { %v203_v6 = vpop.xlane.xlu0 %202 }
  0xd7   : > { %v204_v7 = vsub.f32 %v197_v2, %v203_v6 }
  0xd9   : > { %v205_v8 = vmul.f32 1.442695, %v204_v7 }
  0xda   : > { %v214_v9 = vpop.xlane.xlu0 %213 }
  0xdb   : > { %380 = vpow2.f32 %v205_v8  ;;  %v215_v10 = vsub.f32 %v199_v3, %v214_v9 }
  0xdd   : > { %v216_v11 = vmul.f32 1.442695, %v215_v10  ;;  %v221_v14 = vsub.f32 %v215_v10, %v204_v7 }
  0xdf   : > { %382 = vpow2.f32 %v216_v11 }
  0xe8   : > { %v381_v12 = vpop.eup %380 }
  0xe9   : > { %v207_v13 = vsel %vm200_vm0, %v381_v12, 0.0 }
  0xea   : > { %208 = vadd.xlane.f32.xlu1 %v207_v13 }
  0xec   : > { %v383_v15 = vpop.eup %382 }
  0xed   : > { %v218_v16 = vsel %vm200_vm0, %v383_v15, 0.0  ;;  %v222_v17 = vmul.f32 %v383_v15, %v221_v14 }
  0xee   : > { %219 = vadd.xlane.f32.xlu1 %v218_v16 }
  0xef   : > { %v223_v18 = vsel %vm200_vm0, %v222_v17, 0.0 }
  0xf0   : > { %224 = vadd.xlane.f32.xlu0 %v223_v18 }
 0x173   : > { %v209_v19 = vpop.xlane.xlu1 %208 }
 0x174   : > { %384 = vlog2.f32 %v209_v19 }
 0x177   : > { %v220_v20 = vpop.xlane.xlu1 %219 }
 0x178   : > { %386 = vrcp.f32 %v220_v20 }
 0x179   : > { %388 = vlog2.f32 %v220_v20  ;;  %v225_v26 = vpop.xlane.xlu0 %224 }
 0x181   : > { %v385_v21 = vpop.eup %384 }
 0x182   : > { %v211_v24 = vmul.f32 0.6931472, %v385_v21 }
 0x185   : > { %v387_v22 = vpop.eup %386 }
 0x186   : > { %v389_v23 = vpop.eup %388  ;;  %v228_v27 = vmul.f32 %v387_v22, %v225_v26 }
 0x187   : > { %v230_v25 = vmul.f32 0.6931472, %v389_v23 }
 0x189   : > { %v231_v28 = vsub.f32 %v211_v24, %v230_v25 }
 0x18b   : > { %v232_v29 = vadd.f32 %v231_v28, %v228_v27 }
 0x18d   : > { %234 = vst.msk [vmem:[%s195_s25] sm:$0xff] %vm233_vm1, %v232_v29 }
 0x18e PF: > { %p15_p8 = scmp.ge.s32.totalorder %s525_s14, 4   ;;  %s671_s9 = smov %s476_s10 }
 0x18f   : > { %s672_s10 = smov %s480_s11  ;;  %s673_s11 = smov %s535_s17 }
 0x190   : > { %s674_s12 = smov %s525_s14  ;;  %17 = sbr.rel (!%p15_p8) target bundleno = 5 (0x5), region = 81 }
 0x195   :  { %254 = vsyncpa [#allocation3], 1 }
 0x196   :  { %256 = vsyncpa [#allocation3 + $0x1], 1 }
 0x197   :  { %257 = vsyncpa [#allocation5], 1 }
 0x198   :  { %259 = vsyncpa [#allocation5 + $0x1], 1 }

</bundles_post_ra>
